<compile_context>
chip_gen: v7x
topology: tpu7x:2x2x1
jax: 0.10.0
libtpu: 0.0.40
codegen_flags: <defaults>
</compile_context>

<pallas_src>
import functools

import jax
import jax.numpy as jnp
from jax.experimental import pallas as pl
from jax.experimental.pallas import tpu as pltpu


# ----------------------------- selection networks -----------------------------

def _cmpswap(vals, i, j):
    a, b = vals[i], vals[j]
    vals[i] = jnp.minimum(a, b)
    vals[j] = jnp.maximum(a, b)


def _drop_min_max(vals):
    """Drop one per-pixel min and one per-pixel max element from `vals`."""
    vals = list(vals)
    s = len(vals)
    h = s // 2
    for i in range(h):
        _cmpswap(vals, i, i + h)
    for i in range(1, h):
        _cmpswap(vals, 0, i)
    if s % 2:
        _cmpswap(vals, 0, s - 1)
    for i in range(h, s - 1):
        _cmpswap(vals, i, s - 1)
    return vals[1:s - 1]


def _num_exchanges(n):
    """Compare-exchanges per pixel of the forgetful selection network."""
    if n <= 1:
        return 0
    cnt = 0
    s = (n + 3) // 2
    nxt = s
    while s >= 3:
        h = s // 2
        cnt += 3 * h - 2 if s % 2 == 0 else 3 * h
        s -= 2
        if nxt < n:
            s += 1
            nxt += 1
    return cnt


def _median3(a, b, c):
    """Per-element median of three (4 VPU ops)."""
    return jnp.maximum(jnp.minimum(a, b), jnp.minimum(jnp.maximum(a, b), c))


def _lane_roll(x, shift):
    """np.roll-style circular rotation along the lane (last) axis."""
    L = x.shape[-1]
    shift = shift % L
    if shift == 0:
        return x
    return pltpu.roll(x, shift, axis=x.ndim - 1)


# ---------------------------------- kernel ------------------------------------

def _median_filter_kernel(x_ref, o_ref, *, k, subw):
    """x_ref/o_ref: (Bt, H, L) with L = g*subw packed sub-planes along lanes."""
    Bt, H, L = x_ref.shape
    pad = k // 2
    Ho = H - k + 1
    n = k * k

    if n == 1:
        o_ref[...] = x_ref[...]
        return

    if k == 3:
        # Shared-vertical-column median-of-9 (classic 19-comparison network).
        # Sort each vertical 3-tuple ONCE per lane position (3 CEs), then the 3
        # horizontally adjacent windows reuse it via hoisted lane rolls.
        a0 = x_ref[:, 0:Ho, :]
        a1 = x_ref[:, 1:Ho + 1, :]
        a2 = x_ref[:, 2:Ho + 2, :]
        lo01 = jnp.minimum(a0, a1)
        hi01 = jnp.maximum(a0, a1)
        mid = jnp.minimum(hi01, a2)
        hi = jnp.maximum(hi01, a2)
        lo = jnp.minimum(lo01, mid)
        mid = jnp.maximum(lo01, mid)          # lo <= mid <= hi per column
        lo1, lo2 = _lane_roll(lo, -1), _lane_roll(lo, -2)
        mid1, mid2 = _lane_roll(mid, -1), _lane_roll(mid, -2)
        hi1, hi2 = _lane_roll(hi, -1), _lane_roll(hi, -2)
        max_lo = jnp.maximum(jnp.maximum(lo, lo1), lo2)
        min_hi = jnp.minimum(jnp.minimum(hi, hi1), hi2)
        med_mid = _median3(mid, mid1, mid2)
        med = _median3(max_lo, med_mid, min_hi)     # (Bt, Ho, L)
    else:
        # Forgetful median-selection network; windows built from k-1 hoisted
        # lane rolls (instead of k*(k-1) lane-misaligned slices).
        x = x_ref[...]
        shifted = [x] + [_lane_roll(x, -dj) for dj in range(1, k)]

        def window(idx):
            di, dj = divmod(idx, k)
            return shifted[dj][:, di:di + Ho, :]

        s0 = (n + 3) // 2
        ws = [window(i) for i in range(s0)]
        nxt = s0
        while len(ws) >= 3:
            ws = _drop_min_max(ws)
            if nxt < n:
                ws.append(window(nxt))
                nxt += 1
        med = ws[0]                                  # lower median per pixel

    # ---- epilogue: replicate pad, assembled in registers (lane-dense stores).
    # Within each packed sub-plane of width `subw`, only columns [0, subw-k+1)
    # of `med` are valid; replicate them into a full-width padded slab.
    col = jax.lax.broadcasted_iota(jnp.int32, med.shape, med.ndim - 1) % subw
    w_padded = _lane_roll(med, pad)                  # interior columns
    for t in range(pad):
        # Left border column t of each sub-plane: replicate valid column 0.
        w_padded = jnp.where(col == t, _lane_roll(med, t), w_padded)
        # Right border column subw-pad+t: replicate valid column subw-k.
        w_padded = jnp.where(col == subw - pad + t,
                             _lane_roll(med, pad + 1 + t), w_padded)

    # Row replicate-pad via 3 full-lane-width stores (interior, top, bottom).
    o_ref[:, pad:H - pad, :] = w_padded
    o_ref[:, 0:pad, :] = jnp.broadcast_to(w_padded[:, 0:1, :], (Bt, pad, L))
    o_ref[:, H - pad:H, :] = jnp.broadcast_to(w_padded[:, Ho - 1:Ho, :], (Bt, pad, L))


# --------------------------------- wrapper ------------------------------------

def median_filter(x, kernel_size=3, *, vmem_block_budget_bytes=None):
    """Pallas TPU median filter matching the PyTorch MedianFilter. x: (N,C,H,W)."""
    N, C, H, W = x.shape
    k = int(kernel_size)
    assert k % 2 == 1, "odd kernel_size expected (as in the reference usage)"
    assert H >= k and W >= k

    B = N * C
    itemsize = jnp.dtype(x.dtype).itemsize

    # Lane packing: put g whole planes side-by-side along the 128-lane axis so
    # small-W images fill the vregs.  g must divide B and satisfy g*W <= 128.
    g = 1
    if W < 128:
        for cand in range(min(128 // W, B), 1, -1):
            if B % cand == 0:
                g = cand
                break
    Bp = B // g
    L = g * W
    if g > 1:
        x2 = jnp.transpose(x.reshape(Bp, g, H, W), (0, 2, 1, 3)).reshape(Bp, H, L)
    else:
        x2 = x.reshape(Bp, H, L)

    # Block sizing: several packed planes per grid step, budgeted against VMEM
    # (double-buffered in/out blocks + live selection temporaries).
    n = k * k
    s0 = (n + 3) // 2 if n > 1 else 1
    live_tmp = 16 if k == 3 else (s0 + k + 6)
    plane_bytes = H * L * itemsize
    per_item_bytes = (4 + live_tmp) * plane_bytes

    try:
        vmem_cap = int(pltpu.get_tpu_info().vmem_capacity_bytes)
    except Exception:
        vmem_cap = 64 * 1024 * 1024                 # conservative (v7x per-TC)
    if vmem_block_budget_bytes is None:
        vmem_block_budget_bytes = min(vmem_cap // 4, 32 * 1024 * 1024)

    bt = max(1, min(Bp, vmem_block_budget_bytes // per_item_bytes))
    # Keep >=4 grid steps when possible (>=2 per TensorCore on v7x) so the
    # DMA pipeline has a steady state on both cores.
    bt = min(bt, max(1, pl.cdiv(Bp, 4)))
    grid = (pl.cdiv(Bp, bt),)
    # TODO(synk): halo'd row-strip tiling (2-D grid over (plane, H-strip)) for
    # planes whose single-block footprint exceeds the VMEM cap (v7x: 64 MiB).

    vmem_limit = int(min(max(vmem_cap - (8 << 20), 16 * 1024 * 1024),
                         max(32 * 1024 * 1024, bt * per_item_bytes + (4 << 20))))

    Ho, Wo = H - k + 1, W - k + 1
    ops_per_px = 18 if k == 3 else 2 * _num_exchanges(n)
    cost = pl.CostEstimate(
        flops=int(ops_per_px) * B * Ho * Wo,
        transcendentals=0,
        bytes_accessed=2 * B * H * W * itemsize,
    )

    kernel = functools.partial(_median_filter_kernel, k=k, subw=W)
    out2 = pl.pallas_call(
        kernel,
        out_shape=jax.ShapeDtypeStruct((Bp, H, L), x.dtype),
        grid=grid,
        in_specs=[pl.BlockSpec((bt, H, L), lambda b: (b, 0, 0))],
        out_specs=pl.BlockSpec((bt, H, L), lambda b: (b, 0, 0)),
        compiler_params=pltpu.CompilerParams(
            dimension_semantics=("parallel",),
            vmem_limit_bytes=vmem_limit,
        ),
        cost_estimate=cost,
    )(x2)

    if g > 1:
        out = jnp.transpose(out2.reshape(Bp, H, g, W), (0, 2, 1, 3)).reshape(N, C, H, W)
    else:
        out = out2.reshape(N, C, H, W)
    return out


# -------------------------------- reference -----------------------------------

def _reference_median_filter(x, k):
    """Plain-JAX reference matching the PyTorch semantics."""
    pad = k // 2
    N, C, H, W = x.shape
    Ho, Wo = H - k + 1, W - k + 1
    wins = jnp.stack(
        [x[:, :, di:di + Ho, dj:dj + Wo] for di in range(k) for dj in range(k)],
        axis=-1)
    med = jnp.sort(wins, axis=-1)[..., (k * k - 1) // 2]  # lower median
    return jnp.pad(med, ((0, 0), (0, 0), (pad, pad), (pad, pad)), mode="edge")


if __name__ == "__main__":
    key = jax.random.PRNGKey(0)
    N, C, H, W = 2, 4, 16, 16
    x = jax.random.normal(key, (N, C, H, W), dtype=jnp.float32)

    out = median_filter(x, kernel_size=3)
    out = jax.block_until_ready(out)

    ref = _reference_median_filter(x, 3)
    assert out.shape == (N, C, H, W)
    assert out.dtype == x.dtype
    assert jnp.allclose(out, ref, atol=0.0, rtol=0.0), "mismatch vs reference"

    print("KERNEL_OK")
</pallas_src>

<mosaic_0001>
module attributes {stable_mosaic.version = 11 : i64} {
  func.func @_median_filter_kernel(%arg0: i32, %arg1: memref<1x16x128xf32, #tpu.memory_space<vmem>>, %arg2: memref<1x16x128xf32, #tpu.memory_space<vmem>>) attributes {dimension_semantics = [#tpu.dimension_semantics<parallel>], iteration_bounds = array<i64: 1>, scalar_prefetch = 0 : i64, scratch_operands = 0 : i64, tpu.core_type = #tpu.core_type<tc>, window_params = [{transform_indices = @transform_0, window_bounds = array<i64: 1, 16, 128>}, {transform_indices = @transform_1, window_bounds = array<i64: 1, 16, 128>}]} {
    %c0 = arith.constant 0 : index
    %c0_0 = arith.constant 0 : index
    %c0_1 = arith.constant 0 : index
    %0 = vector.load %arg1[%c0, %c0_0, %c0_1] : memref<1x16x128xf32, #tpu.memory_space<vmem>>, vector<1x14x128xf32>
    %c0_2 = arith.constant 0 : index
    %c1 = arith.constant 1 : index
    %c0_3 = arith.constant 0 : index
    %1 = vector.load %arg1[%c0_2, %c1, %c0_3] : memref<1x16x128xf32, #tpu.memory_space<vmem>>, vector<1x14x128xf32>
    %c0_4 = arith.constant 0 : index
    %c2 = arith.constant 2 : index
    %c0_5 = arith.constant 0 : index
    %2 = vector.load %arg1[%c0_4, %c2, %c0_5] : memref<1x16x128xf32, #tpu.memory_space<vmem>>, vector<1x14x128xf32>
    %3 = arith.minimumf %0, %1 : vector<1x14x128xf32>
    %4 = arith.maximumf %0, %1 : vector<1x14x128xf32>
    %5 = arith.minimumf %4, %2 : vector<1x14x128xf32>
    %6 = arith.maximumf %4, %2 : vector<1x14x128xf32>
    %7 = arith.minimumf %3, %5 : vector<1x14x128xf32>
    %8 = arith.maximumf %3, %5 : vector<1x14x128xf32>
    %c127_i32 = arith.constant 127 : i32
    %9 = tpu.dynamic_rotate %7 by %c127_i32 dim 2 : vector<1x14x128xf32>, i32 -> vector<1x14x128xf32>
    %c126_i32 = arith.constant 126 : i32
    %10 = tpu.dynamic_rotate %7 by %c126_i32 dim 2 : vector<1x14x128xf32>, i32 -> vector<1x14x128xf32>
    %c127_i32_6 = arith.constant 127 : i32
    %11 = tpu.dynamic_rotate %8 by %c127_i32_6 dim 2 : vector<1x14x128xf32>, i32 -> vector<1x14x128xf32>
    %c126_i32_7 = arith.constant 126 : i32
    %12 = tpu.dynamic_rotate %8 by %c126_i32_7 dim 2 : vector<1x14x128xf32>, i32 -> vector<1x14x128xf32>
    %c127_i32_8 = arith.constant 127 : i32
    %13 = tpu.dynamic_rotate %6 by %c127_i32_8 dim 2 : vector<1x14x128xf32>, i32 -> vector<1x14x128xf32>
    %c126_i32_9 = arith.constant 126 : i32
    %14 = tpu.dynamic_rotate %6 by %c126_i32_9 dim 2 : vector<1x14x128xf32>, i32 -> vector<1x14x128xf32>
    %15 = arith.maximumf %7, %9 : vector<1x14x128xf32>
    %16 = arith.maximumf %15, %10 : vector<1x14x128xf32>
    %17 = arith.minimumf %6, %13 : vector<1x14x128xf32>
    %18 = arith.minimumf %17, %14 : vector<1x14x128xf32>
    %19 = arith.minimumf %8, %11 : vector<1x14x128xf32>
    %20 = arith.maximumf %8, %11 : vector<1x14x128xf32>
    %21 = arith.minimumf %20, %12 : vector<1x14x128xf32>
    %22 = arith.maximumf %19, %21 : vector<1x14x128xf32>
    %23 = arith.minimumf %16, %22 : vector<1x14x128xf32>
    %24 = arith.maximumf %16, %22 : vector<1x14x128xf32>
    %25 = arith.minimumf %24, %18 : vector<1x14x128xf32>
    %26 = arith.maximumf %23, %25 : vector<1x14x128xf32>
    %27 = tpu.iota {dimensions = array<i32: 2>} : vector<1x14x128xi32>
    %c16_i32 = arith.constant 16 : i32
    %c0_i32 = arith.constant 0 : i32
    %28 = arith.cmpi eq, %c16_i32, %c0_i32 : i32
    %c1_i32 = arith.constant 1 : i32
    %29 = arith.select %28, %c1_i32, %c16_i32 : i32
    %30 = vector.broadcast %29 : i32 to vector<1x14x128xi32>
    %31 = arith.remsi %27, %30 : vector<1x14x128xi32>
    %c0_i32_10 = arith.constant 0 : i32
    %32 = vector.broadcast %c0_i32_10 : i32 to vector<1x14x128xi32>
    %33 = arith.cmpi ne, %31, %32 : vector<1x14x128xi32>
    %c0_i32_11 = arith.constant 0 : i32
    %34 = vector.broadcast %c0_i32_11 : i32 to vector<1x14x128xi32>
    %35 = arith.cmpi slt, %31, %34 : vector<1x14x128xi32>
    %c0_i32_12 = arith.constant 0 : i32
    %36 = arith.cmpi slt, %29, %c0_i32_12 : i32
    %37 = vector.broadcast %36 : i1 to vector<1x14x128xi1>
    %38 = vector.broadcast %37 : vector<1x14x128xi1> to vector<1x14x128xi1>
    %39 = arith.xori %35, %38 : vector<1x14x128xi1>
    %40 = arith.andi %39, %33 : vector<1x14x128xi1>
    %41 = vector.broadcast %29 : i32 to vector<1x14x128xi32>
    %42 = arith.addi %31, %41 : vector<1x14x128xi32>
    %43 = arith.select %40, %42, %31 : vector<1x14x128xi1>, vector<1x14x128xi32>
    %c1_i32_13 = arith.constant 1 : i32
    %44 = tpu.dynamic_rotate %26 by %c1_i32_13 dim 2 : vector<1x14x128xf32>, i32 -> vector<1x14x128xf32>
    %c0_i32_14 = arith.constant 0 : i32
    %45 = vector.broadcast %c0_i32_14 : i32 to vector<1x14x128xi32>
    %46 = arith.cmpi eq, %43, %45 : vector<1x14x128xi32>
    %47 = arith.select %46, %26, %44 : vector<1x14x128xi1>, vector<1x14x128xf32>
    %c15_i32 = arith.constant 15 : i32
    %48 = vector.broadcast %c15_i32 : i32 to vector<1x14x128xi32>
    %49 = arith.cmpi eq, %43, %48 : vector<1x14x128xi32>
    %c2_i32 = arith.constant 2 : i32
    %50 = tpu.dynamic_rotate %26 by %c2_i32 dim 2 : vector<1x14x128xf32>, i32 -> vector<1x14x128xf32>
    %51 = arith.select %49, %50, %47 : vector<1x14x128xi1>, vector<1x14x128xf32>
    %c0_15 = arith.constant 0 : index
    %c1_16 = arith.constant 1 : index
    %c0_17 = arith.constant 0 : index
    %52 = vector.load %arg2[%c0_15, %c1_16, %c0_17] : memref<1x16x128xf32, #tpu.memory_space<vmem>>, vector<1x14x128xf32>
    tpu.vector_store %arg2[%c0_15, %c1_16, %c0_17], %51 {strides = array<i32>} : memref<1x16x128xf32, #tpu.memory_space<vmem>>, vector<1x14x128xf32>,
    %53 = vector.extract_strided_slice %51 {offsets = [0, 0, 0], sizes = [1, 1, 128], strides = [1, 1, 1]} : vector<1x14x128xf32> to vector<1x1x128xf32>
    %c0_18 = arith.constant 0 : index
    %c0_19 = arith.constant 0 : index
    %c0_20 = arith.constant 0 : index
    %54 = vector.load %arg2[%c0_18, %c0_19, %c0_20] : memref<1x16x128xf32, #tpu.memory_space<vmem>>, vector<1x1x128xf32>
    tpu.vector_store %arg2[%c0_18, %c0_19, %c0_20], %53 {strides = array<i32>} : memref<1x16x128xf32, #tpu.memory_space<vmem>>, vector<1x1x128xf32>,
    %55 = vector.extract_strided_slice %51 {offsets = [0, 13, 0], sizes = [1, 1, 128], strides = [1, 1, 1]} : vector<1x14x128xf32> to vector<1x1x128xf32>
    %c0_21 = arith.constant 0 : index
    %c15 = arith.constant 15 : index
    %c0_22 = arith.constant 0 : index
    %56 = vector.load %arg2[%c0_21, %c15, %c0_22] : memref<1x16x128xf32, #tpu.memory_space<vmem>>, vector<1x1x128xf32>
    tpu.vector_store %arg2[%c0_21, %c15, %c0_22], %55 {strides = array<i32>} : memref<1x16x128xf32, #tpu.memory_space<vmem>>, vector<1x1x128xf32>,
    return
  }
  func.func @transform_0(%arg0: i32) -> (i32, i32, i32) {
    %c0_i32 = arith.constant 0 : i32
    %c0_i32_0 = arith.constant 0 : i32
    %c0_i32_1 = arith.constant 0 : i32
    return %arg0, %c0_i32, %c0_i32_0 : i32, i32, i32
  }
  func.func @transform_1(%arg0: i32) -> (i32, i32, i32) {
    %c0_i32 = arith.constant 0 : i32
    %c0_i32_0 = arith.constant 0 : i32
    %c0_i32_1 = arith.constant 0 : i32
    return %arg0, %c0_i32, %c0_i32_0 : i32, i32, i32
  }
}

</mosaic_0001>

<bundles_post_ra>
// kernel: tpu_custom_call.1
= control target key start
LH: loop header
LB: loop body
LE: loop exit
PB: predicated region body
PF: predicated region fallthrough
CT: control target
= control target key end

     0   :  { %6 = vsyncpa [#allocation3], 0  ;;  %s242_s0 = inlined_call_operand.hbm [shape: f32[1,16,128], index: 0, kind: input, shape index: {}]   ;;  %s243_s1 = inlined_call_operand.hbm [shape: f32[1,16,128], index: 1, kind: output, shape index: {}]  }
   0x1   :  { %7 = vsyncpa [#allocation4], 0  ;;  %s194_s6 = smov [#allocation2]   ;;  %s146_s10 = scalar_lea.hbm %s242_s0, 256 }
   0x2   :  { %s13_s7 = sshll.u32 %s194_s6, 4  ;;  %p147_p0 = scmp.ne.s32.totalorder %s242_s0, %s146_s10  ;;  %s14_s7 = int_to_ptr.vmem [resolvable:$true] %s13_s7 }
   0x3   :  { %p150_p1 = scmp.lt.u32.totalorder %s146_s10, %s242_s0 }
   0x5   :  { %p152_p2 = pnand %p150_p1, %p147_p0 }
   0x7   :  { %155 = shalt.err (!%p152_p2)
}
   0x8   :  { %s156_s15 = scalar_lea.vmem %s14_s7, 256  ;;  %p161_p4 = scmp.lt.s32.totalorder %s14_s7, %s14_s7 }
   0x9   :  { %p157_p3 = scmp.ne.s32.totalorder %s14_s7, %s156_s15  ;;  %p162_p5 = scmp.lt.s32.totalorder %s156_s15, %s156_s15 }
   0xb   :  { %p163_p6 = por %p162_p5, %p161_p4 }
   0xd   :  { %p164_p7 = pnand %p163_p6, %p157_p3 }
   0xf   :  { %167 = shalt.err (!%p164_p7)
}
  0x10   :  { %s195_s16 = smov 128   ;;  %s196_s17 = smov 8  }
  0x11   :  { %19 = dma.hbm_to_vmem [thread:$0]  %s242_s0, 256, %s14_s7, [#allocation3], %s195_s16, %s195_s16, %s196_s17  }
  0x12   :  { %190 = dma.done.wait [#allocation3], 256  }
  0x13   :  { %191 = vsyncadd [#allocation3], 4294967040  ;;  %v23_v0 = vld [vmem:[#allocation2] sm:$0xff]  ;;  %v24_v5 = vld [vmem:[#allocation2 + $0x8] sm:$0x3f]  ;;  %s197_s20 = smov 127   ;;  %v89_v54 = vlaneseq }
  0x14   :  { %v25_v1 = vld [vmem:[#allocation2 + $0x1] sm:$0xff]  ;;  %v26_v6 = vld [vmem:[#allocation2 + $0x9] sm:$0x3f]  ;;  %s198_s0 = smov 126   ;;  %s199_s21 = smov 1  }
  0x15   :  { %v27_v2 = vld [vmem:[#allocation2 + $0x2] sm:$0xff]  ;;  %v29_v3 = vmin.f32 %v23_v0, %v25_v1  ;;  %v31_v4 = vmax.f32 %v23_v0, %v25_v1  ;;  %v28_v7 = vld [vmem:[#allocation2 + $0xa] sm:$0x3f]  ;;  %v32_v8 = vmax.f32 %v24_v5, %v26_v6  ;;  %v30_v10 = vmin.f32 %v24_v5, %v26_v6  ;;  %s200_s22 = smov 2   ;;  %s201_s23 = smov [#allocation5]  }
  0x16   :  { %v90_v55 = vand.u32 127, %v89_v54  ;;  %s126_s24 = sshll.u32 %s201_s23, 4  ;;  %s127_s24 = int_to_ptr.vmem [resolvable:$true] %s126_s24 }
  0x17   :  { %v33_v9 = vmin.f32 %v31_v4, %v27_v2  ;;  %v34_v11 = vmin.f32 %v32_v8, %v28_v7  ;;  %v35_v16 = vmax.f32 %v31_v4, %v27_v2  ;;  %v36_v17 = vmax.f32 %v32_v8, %v28_v7  ;;  %s168_s25 = scalar_lea.vmem %s127_s24, 256  ;;  %p173_p9 = scmp.lt.s32.totalorder %s127_s24, %s127_s24 }
  0x18   :  { %v95_v56 = vand.u32 15, %v90_v55  ;;  %p169_p8 = scmp.ne.s32.totalorder %s127_s24, %s168_s25  ;;  %p174_p10 = scmp.lt.s32.totalorder %s168_s25, %s168_s25 }
  0x19   :  { %v39_v12 = vmax.f32 %v29_v3, %v33_v9  ;;  %v37_v13 = vmin.f32 %v29_v3, %v33_v9  ;;  %v40_v14 = vmax.f32 %v30_v10, %v34_v11  ;;  %v38_v15 = vmin.f32 %v30_v10, %v34_v11 }
  0x1a   :  { %vm107_vm0 = vcmp.eq.s32.totalorder %v95_v56, 0  ;;  %vm110_vm1 = vcmp.eq.s32.totalorder %v95_v56, 15  ;;  %p175_p11 = por %p174_p10, %p173_p9 }
  0x1b   :  { %49 = vrot.lane.b32.xlu0 %v39_v12, %s197_s20  ;;  %41 = vrot.lane.b32.xlu1 %v37_v13, %s197_s20 }
  0x1c   :  { %p176_p12 = pnand %p175_p11, %p169_p8 }
  0x1f   :  { %51 = vrot.lane.b32.xlu0 %v40_v14, %s197_s20  ;;  %43 = vrot.lane.b32.xlu1 %v38_v15, %s197_s20 }
  0x23   :  { %53 = vrot.lane.b32.xlu0 %v39_v12, %s198_s0  ;;  %55 = vrot.lane.b32.xlu1 %v40_v14, %s198_s0 }
  0x27   :  { %45 = vrot.lane.b32.xlu0 %v37_v13, %s198_s0  ;;  %47 = vrot.lane.b32.xlu1 %v38_v15, %s198_s0 }
  0x2b   :  { %57 = vrot.lane.b32.xlu0 %v35_v16, %s197_s20  ;;  %59 = vrot.lane.b32.xlu1 %v36_v17, %s197_s20 }
  0x2f   :  { %61 = vrot.lane.b32.xlu0 %v35_v16, %s198_s0  ;;  %63 = vrot.lane.b32.xlu1 %v36_v17, %s198_s0 }
  0x8d   :  { %v50_v18 = vpop.permute.xlu0 %49  ;;  %v42_v19 = vpop.permute.xlu1 %41 }
  0x8e   :  { %v75_v26 = vmax.f32 %v39_v12, %v50_v18  ;;  %v65_v28 = vmax.f32 %v37_v13, %v42_v19  ;;  %v73_v34 = vmin.f32 %v39_v12, %v50_v18 }
  0x91   :  { %v52_v20 = vpop.permute.xlu0 %51  ;;  %v44_v21 = vpop.permute.xlu1 %43 }
  0x92   :  { %v76_v27 = vmax.f32 %v40_v14, %v52_v20  ;;  %v66_v29 = vmax.f32 %v38_v15, %v44_v21  ;;  %v74_v35 = vmin.f32 %v40_v14, %v52_v20 }
  0x95   :  { %v54_v22 = vpop.permute.xlu0 %53  ;;  %v56_v23 = vpop.permute.xlu1 %55 }
  0x96   :  { %v77_v30 = vmin.f32 %v75_v26, %v54_v22  ;;  %v78_v31 = vmin.f32 %v76_v27, %v56_v23 }
  0x98   :  { %v79_v38 = vmax.f32 %v73_v34, %v77_v30  ;;  %v80_v39 = vmax.f32 %v74_v35, %v78_v31 }
  0x99   :  { %v46_v24 = vpop.permute.xlu0 %45  ;;  %v48_v25 = vpop.permute.xlu1 %47 }
  0x9a   :  { %v67_v36 = vmax.f32 %v65_v28, %v46_v24  ;;  %v68_v37 = vmax.f32 %v66_v29, %v48_v25 }
  0x9c   :  { %v83_v44 = vmax.f32 %v67_v36, %v79_v38  ;;  %v84_v45 = vmax.f32 %v68_v37, %v80_v39  ;;  %v81_v48 = vmin.f32 %v67_v36, %v79_v38  ;;  %v82_v49 = vmin.f32 %v68_v37, %v80_v39 }
  0x9d   :  { %v58_v32 = vpop.permute.xlu0 %57  ;;  %v60_v33 = vpop.permute.xlu1 %59 }
  0x9e   :  { %v69_v40 = vmin.f32 %v35_v16, %v58_v32  ;;  %v70_v41 = vmin.f32 %v36_v17, %v60_v33 }
  0xa1   :  { %v62_v42 = vpop.permute.xlu0 %61  ;;  %v64_v43 = vpop.permute.xlu1 %63 }
  0xa2   :  { %v71_v46 = vmin.f32 %v69_v40, %v62_v42  ;;  %v72_v47 = vmin.f32 %v70_v41, %v64_v43 }
  0xa4   :  { %v85_v50 = vmin.f32 %v83_v44, %v71_v46  ;;  %v86_v51 = vmin.f32 %v84_v45, %v72_v47 }
  0xa6   :  { %v87_v52 = vmax.f32 %v81_v48, %v85_v50  ;;  %v88_v53 = vmax.f32 %v82_v49, %v86_v51 }
  0xa8   :  { %103 = vrot.lane.b32.xlu0 %v87_v52, %s199_s21  ;;  %105 = vrot.lane.b32.xlu1 %v88_v53, %s199_s21 }
  0xac   :  { %111 = vrot.lane.b32.xlu0 %v87_v52, %s200_s22  ;;  %113 = vrot.lane.b32.xlu1 %v88_v53, %s200_s22 }
 0x11a   :  { %v104_v57 = vpop.permute.xlu0 %103  ;;  %v106_v58 = vpop.permute.xlu1 %105 }
 0x11b   :  { %v108_v59 = vsel %vm107_vm0, %v87_v52, %v104_v57  ;;  %v109_v60 = vsel %vm107_vm0, %v88_v53, %v106_v58 }
 0x11e   :  { %v112_v61 = vpop.permute.xlu0 %111  ;;  %v114_v62 = vpop.permute.xlu1 %113 }
 0x11f   :  { %v115_v63 = vsel %vm110_vm1, %v112_v61, %v108_v59  ;;  %v116_v0 = vsel %vm110_vm1, %v114_v62, %v109_v60 }
 0x120   :  { %117 = vst [vmem:[#allocation5 + $0x1] sm:$0xff] %v115_v63  ;;  %119 = vst [vmem:[#allocation5] sm:$0x1] %v115_v63 }
 0x121   :  { %118 = vst [vmem:[#allocation5 + $0x9] sm:$0x3f] %v116_v0  ;;  %120 = vst [vmem:[#allocation5 + $0xa] sm:$0x20] %v116_v0 }
 0x122   :  { %179 = shalt.err (!%p176_p12)
}
 0x123   :  { %s180_s28 = scalar_lea.hbm %s243_s1, 256 }
 0x124   :  { %p181_p13 = scmp.ne.s32.totalorder %s243_s1, %s180_s28  ;;  %p184_p0 = scmp.lt.u32.totalorder %s180_s28, %s243_s1 }
 0x126   :  { %p186_p1 = pnand %p184_p0, %p181_p13 }
 0x128   :  { %189 = shalt.err (!%p186_p1)
}
 0x129   :  { %132 = dma.vmem_to_hbm [thread:$0]  %s127_s24, 256, %s243_s1, [#allocation4], %s195_s16, %s195_s16, %s196_s17  }
 0x12a   :  { %192 = dma.done.wait [#allocation4], 256  }
 0x12b   :  { %193 = vsyncadd [#allocation4], 4294967040 }
 0x12c   :  { %136 = vsyncpa [#allocation3], 1 }
 0x12d   :  { %137 = vsyncpa [#allocation4], 1 }

</bundles_post_ra>
